<compile_context>
chip_gen: v5e
topology: v5e:2x2
jax: 0.10.0
libtpu: 0.0.40
codegen_flags: <defaults>
</compile_context>

<pallas_src>
import functools

import jax
import jax.numpy as jnp
from jax.experimental import pallas as pl
from jax.experimental.pallas import tpu as pltpu


_MASK_NEG = -1e30       # finite "-inf": avoids NaN for fully-masked rows
_LOG2E = 1.4426950408889634


def _largest_divisor_tile(n, target, step=8):
    """Largest multiple of `step` that divides n and is <= target (else n)."""
    cap = min(n, target)
    cap -= cap % step
    for t in range(cap, 0, -step):
        if n % t == 0:
            return t
    return n


def _pick_vmem_limit():
    """Generation-aware scoped-VMEM budget: ~half of physical VMEM.

    v7x has 64 MiB/TC -> ~32 MiB budget; v5e/v6e have 128 MiB -> ~64 MiB.
    """
    try:
        cap = int(pltpu.get_tpu_info().vmem_capacity_bytes)
    except Exception:
        cap = 64 * 1024 * 1024          # conservative (v7x-sized) fallback
    return int(min(max(cap // 2, 32 * 1024 * 1024), 100 * 1024 * 1024))


# --------------------------------------------------------------------------
# Kernel 1: fused QKV projection over (B*L, E) rows.
# --------------------------------------------------------------------------
def _qkv_proj_kernel(x_ref, wq_ref, wk_ref, wv_ref, bq_ref, bk_ref, bv_ref,
                     q_ref, k_ref, v_ref):
    xb = x_ref[...].astype(jnp.bfloat16)                      # (TM, E)
    q = jnp.dot(xb, wq_ref[...], preferred_element_type=jnp.float32) + bq_ref[...]
    k = jnp.dot(xb, wk_ref[...], preferred_element_type=jnp.float32) + bk_ref[...]
    v = jnp.dot(xb, wv_ref[...], preferred_element_type=jnp.float32) + bv_ref[...]
    q_ref[...] = q.astype(q_ref.dtype)
    k_ref[...] = k.astype(k_ref.dtype)
    v_ref[...] = v.astype(v_ref.dtype)


# --------------------------------------------------------------------------
# Kernel 2: flash-style attention (online softmax over K blocks)
#           + output projection + residual, per (batch, q-tile).
# --------------------------------------------------------------------------
def _flash_attn_out_kernel(q_ref, k_ref, v_ref, mask_ref, wo_ref, bo_ref,
                           xres_ref, o_ref, m_sc, l_sc, acc_sc,
                           *, num_heads, head_dim):
    ki = pl.program_id(2)

    @pl.when(ki == 0)
    def _init():
        m_sc[...] = jnp.full_like(m_sc, _MASK_NEG)
        l_sc[...] = jnp.zeros_like(l_sc)
        acc_sc[...] = jnp.zeros_like(acc_sc)

    # Additive mask bias (additive in log2 space too). Single select: no
    # int8->f32 convert + multiply per score element.
    mask_bias = jnp.where(mask_ref[0] != 0,
                          jnp.float32(_MASK_NEG), jnp.float32(0.0))   # (TQ, TK)

    for h in range(num_heads):
        s = h * head_dim
        e = s + head_dim
        # Slice the refs (not pre-loaded full tiles): loads land inside the
        # head loop, cutting vreg live ranges.
        qh = q_ref[0, :, s:e]                    # (TQ, hd) bf16, * log2e/sqrt(hd)
        kh = k_ref[0, :, s:e]                    # (TK, hd) bf16
        vh = v_ref[0, :, s:e]                    # (TK, hd) bf16

        # scores = qh @ kh^T, contracting head_dim (no transpose materialized).
        scores = jax.lax.dot_general(
            qh, kh, (((1,), (1,)), ((), ())),
            preferred_element_type=jnp.float32)  # (TQ, TK) f32, log2 units
        scores = scores + mask_bias

        m_prev = m_sc[h]                                             # (TQ, 1)
        m_new = jnp.maximum(m_prev, jnp.max(scores, axis=-1, keepdims=True))
        alpha = jnp.exp2(m_prev - m_new)                             # (TQ, 1)
        # TODO(synk): cast (scores - m_new) to bf16 before exp2 on v6e/v7x
        # (bf16 EUP); kept f32 so the same kernel stays optimal on v5e.
        p = jnp.exp2(scores - m_new)                                 # (TQ, TK)

        l_sc[h] = alpha * l_sc[h] + jnp.sum(p, axis=-1, keepdims=True)
        m_sc[h] = m_new

        pv = jnp.dot(p.astype(jnp.bfloat16), vh,
                     preferred_element_type=jnp.float32)             # (TQ, hd)
        # Unnormalized accumulation; normalization is deferred to the end and
        # applied to the (TQ, hd) accumulator, not the (TQ, TK) probabilities.
        acc_sc[:, s:e] = alpha * acc_sc[:, s:e] + pv

    @pl.when(ki == pl.num_programs(2) - 1)
    def _finalize():
        for h in range(num_heads):
            s = h * head_dim
            e = s + head_dim
            inv = 1.0 / l_sc[h]                  # exact reciprocal on (TQ, 1)
            acc_sc[:, s:e] = acc_sc[:, s:e] * inv
        out = jnp.dot(acc_sc[...].astype(jnp.bfloat16), wo_ref[...],
                      preferred_element_type=jnp.float32)
        out = out + bo_ref[...] + xres_ref[0]
        o_ref[0] = out.astype(o_ref.dtype)


# --------------------------------------------------------------------------
# Wrapper
# --------------------------------------------------------------------------
def multihead_attention1(input_qkv, input_mask, w_in, b_in, w_out, b_out,
                         *, num_heads):
    """input_qkv: (B, L, E) f32; input_mask: (B, L, L), nonzero == masked."""
    B, L, E = input_qkv.shape
    assert E % num_heads == 0
    head_dim = E // num_heads
    # Fold attention scale AND log2(e) (kernel uses exp2 on the EUP) into Wq/bq.
    q_scale = (1.0 / ((E / num_heads) ** 0.5)) * _LOG2E

    wq, wk, wv = jnp.split(w_in, 3, axis=1)
    bq, bk, bv = jnp.split(b_in, 3, axis=0)
    wq_b = (wq * q_scale).astype(jnp.bfloat16)
    wk_b = wk.astype(jnp.bfloat16)
    wv_b = wv.astype(jnp.bfloat16)
    bq2 = (bq * q_scale).reshape(1, E).astype(jnp.float32)
    bk2 = bk.reshape(1, E).astype(jnp.float32)
    bv2 = bv.reshape(1, E).astype(jnp.float32)
    wo_b = w_out.astype(jnp.bfloat16)
    bo2 = b_out.reshape(1, E).astype(jnp.float32)

    vmem_bytes = _pick_vmem_limit()
    big_vmem = vmem_bytes >= 64 * 1024 * 1024

    # ---- Kernel 1: QKV projection over folded (B*L, E) rows ----------------
    BL = B * L
    x2d = input_qkv.reshape(BL, E)
    TM = _largest_divisor_tile(BL, 1024 if big_vmem else 512)

    q2d, k2d, v2d = pl.pallas_call(
        _qkv_proj_kernel,
        out_shape=(jax.ShapeDtypeStruct((BL, E), jnp.bfloat16),
                   jax.ShapeDtypeStruct((BL, E), jnp.bfloat16),
                   jax.ShapeDtypeStruct((BL, E), jnp.bfloat16)),
        grid_spec=pltpu.PrefetchScalarGridSpec(
            num_scalar_prefetch=0,
            grid=(BL // TM,),
            in_specs=[
                pl.BlockSpec((TM, E), lambda i: (i, 0)),      # x rows
                pl.BlockSpec((E, E), lambda i: (0, 0)),       # Wq (pre-scaled)
                pl.BlockSpec((E, E), lambda i: (0, 0)),       # Wk
                pl.BlockSpec((E, E), lambda i: (0, 0)),       # Wv
                pl.BlockSpec((1, E), lambda i: (0, 0)),       # bq (pre-scaled)
                pl.BlockSpec((1, E), lambda i: (0, 0)),       # bk
                pl.BlockSpec((1, E), lambda i: (0, 0)),       # bv
            ],
            out_specs=[
                pl.BlockSpec((TM, E), lambda i: (i, 0)),
                pl.BlockSpec((TM, E), lambda i: (i, 0)),
                pl.BlockSpec((TM, E), lambda i: (i, 0)),
            ],
        ),
        compiler_params=pltpu.CompilerParams(
            dimension_semantics=("parallel",),
            vmem_limit_bytes=vmem_bytes),
    )(x2d, wq_b, wk_b, wv_b, bq2, bk2, bv2)

    q3d = q2d.reshape(B, L, E)
    k3d = k2d.reshape(B, L, E)
    v3d = v2d.reshape(B, L, E)
    # (mask != 0) first so nonzero multiples of 256 don't wrap to 0 in int8.
    mask_i8 = (input_mask != 0).astype(jnp.int8)

    # ---- Kernel 2: flash attention + output projection + residual ----------
    TQ = _largest_divisor_tile(L, 512 if big_vmem else 256)
    TK = _largest_divisor_tile(L, 512)
    n_qblk = L // TQ
    n_kblk = L // TK

    kernel2 = functools.partial(_flash_attn_out_kernel,
                                num_heads=num_heads, head_dim=head_dim)

    out = pl.pallas_call(
        kernel2,
        out_shape=jax.ShapeDtypeStruct((B, L, E), input_qkv.dtype),
        grid_spec=pltpu.PrefetchScalarGridSpec(
            num_scalar_prefetch=0,
            grid=(B, n_qblk, n_kblk),
            in_specs=[
                pl.BlockSpec((1, TQ, E), lambda b, qi, ki: (b, qi, 0)),    # q tile
                pl.BlockSpec((1, TK, E), lambda b, qi, ki: (b, ki, 0)),    # k block
                pl.BlockSpec((1, TK, E), lambda b, qi, ki: (b, ki, 0)),    # v block
                pl.BlockSpec((1, TQ, TK), lambda b, qi, ki: (b, qi, ki)),  # mask tile
                pl.BlockSpec((E, E), lambda b, qi, ki: (0, 0)),            # W_out
                pl.BlockSpec((1, E), lambda b, qi, ki: (0, 0)),            # b_out
                pl.BlockSpec((1, TQ, E), lambda b, qi, ki: (b, qi, 0)),    # residual x
            ],
            out_specs=pl.BlockSpec((1, TQ, E), lambda b, qi, ki: (b, qi, 0)),
            scratch_shapes=[
                pltpu.VMEM((num_heads, TQ, 1), jnp.float32),   # running max m
                pltpu.VMEM((num_heads, TQ, 1), jnp.float32),   # running sum l
                pltpu.VMEM((TQ, E), jnp.float32),              # ctx accumulator
            ],
        ),
        compiler_params=pltpu.CompilerParams(
            # Two leading "parallel" axes keep both v7x TensorCores busy;
            # the K-block axis is the reduction and stays innermost/"arbitrary".
            dimension_semantics=("parallel", "parallel", "arbitrary"),
            vmem_limit_bytes=vmem_bytes),
    )(q3d, k3d, v3d, mask_i8, wo_b, bo2, input_qkv)

    return out


# --------------------------------------------------------------------------
# Pure-JAX reference (mirrors the PyTorch forward, eval mode, no layer norms)
# --------------------------------------------------------------------------
def _reference(input_qkv, input_mask, w_in, b_in, w_out, b_out, *, num_heads):
    B, L, E = input_qkv.shape
    hd = E // num_heads
    qkv = input_qkv @ w_in + b_in
    q, k, v = jnp.split(qkv, 3, axis=-1)
    q = q.reshape(B, L, num_heads, hd).transpose(0, 2, 1, 3)
    k = k.reshape(B, L, num_heads, hd).transpose(0, 2, 1, 3)
    v = v.reshape(B, L, num_heads, hd).transpose(0, 2, 1, 3)
    scores = jnp.einsum('bhqd,bhkd->bhqk', q, k) / (E / num_heads) ** 0.5
    scores = jnp.where(input_mask[:, None, :, :] != 0, -jnp.inf, scores)
    p = jax.nn.softmax(scores, axis=-1)
    ctx = jnp.einsum('bhqk,bhkd->bhqd', p, v)
    ctx = ctx.transpose(0, 2, 1, 3).reshape(B, L, E)
    out = ctx @ w_out + b_out
    return out + input_qkv


if __name__ == "__main__":
    B, L, E, H = 2, 8, 32, 4

    key = jax.random.PRNGKey(0)
    k_x, k_wi, k_bi, k_wo, k_bo = jax.random.split(key, 5)

    x = jax.random.normal(k_x, (B, L, E), dtype=jnp.float32)

    # deterministic init mirroring init_parameters() bounds
    bound_wi = (1.5 / E) ** 0.5
    bound_bi = (1.0 / E) ** 0.5
    bound_o = (3.0 / E) ** 0.5
    w_in = jax.random.uniform(k_wi, (E, 3 * E), jnp.float32, -bound_wi, bound_wi)
    b_in = jax.random.uniform(k_bi, (3 * E,), jnp.float32, -bound_bi, bound_bi)
    w_out = jax.random.uniform(k_wo, (E, E), jnp.float32, -bound_o, bound_o)
    b_out = jax.random.uniform(k_bo, (E,), jnp.float32, -bound_o, bound_o)

    # causal mask: nonzero == masked (future positions)
    row = jnp.arange(L)
    mask = (row[None, :] > row[:, None]).astype(jnp.int32)    # (L, L)
    mask = jnp.broadcast_to(mask[None], (B, L, L))

    out = multihead_attention1(x, mask, w_in, b_in, w_out, b_out, num_heads=H)
    out = jax.block_until_ready(out)

    ref = _reference(x, mask, w_in, b_in, w_out, b_out, num_heads=H)
    # bf16 MXU operands -> slightly looser tolerance vs f32 reference.
    assert jnp.allclose(out, ref, atol=5e-2, rtol=5e-2), "mismatch vs reference"

    print("KERNEL_OK")
</pallas_src>

<mosaic_0001>
module attributes {stable_mosaic.version = 11 : i64} {
  func.func @_qkv_proj_kernel(%arg0: i32, %arg1: memref<16x32xf32, #tpu.memory_space<vmem>>, %arg2: memref<32x32xbf16, #tpu.memory_space<vmem>>, %arg3: memref<32x32xbf16, #tpu.memory_space<vmem>>, %arg4: memref<32x32xbf16, #tpu.memory_space<vmem>>, %arg5: memref<1x32xf32, #tpu.memory_space<vmem>>, %arg6: memref<1x32xf32, #tpu.memory_space<vmem>>, %arg7: memref<1x32xf32, #tpu.memory_space<vmem>>, %arg8: memref<16x32xbf16, #tpu.memory_space<vmem>>, %arg9: memref<16x32xbf16, #tpu.memory_space<vmem>>, %arg10: memref<16x32xbf16, #tpu.memory_space<vmem>>) attributes {dimension_semantics = [#tpu.dimension_semantics<parallel>], iteration_bounds = array<i64: 1>, scalar_prefetch = 0 : i64, scratch_operands = 0 : i64, tpu.core_type = #tpu.core_type<tc>, window_params = [{transform_indices = @transform_0, window_bounds = array<i64: 16, 32>}, {pipeline_mode = #tpu.pipeline_mode<synchronous>, transform_indices = @transform_1, window_bounds = array<i64: 32, 32>}, {pipeline_mode = #tpu.pipeline_mode<synchronous>, transform_indices = @transform_2, window_bounds = array<i64: 32, 32>}, {pipeline_mode = #tpu.pipeline_mode<synchronous>, transform_indices = @transform_3, window_bounds = array<i64: 32, 32>}, {pipeline_mode = #tpu.pipeline_mode<synchronous>, transform_indices = @transform_4, window_bounds = array<i64: 1, 32>}, {pipeline_mode = #tpu.pipeline_mode<synchronous>, transform_indices = @transform_5, window_bounds = array<i64: 1, 32>}, {pipeline_mode = #tpu.pipeline_mode<synchronous>, transform_indices = @transform_6, window_bounds = array<i64: 1, 32>}, {transform_indices = @transform_7, window_bounds = array<i64: 16, 32>}, {transform_indices = @transform_8, window_bounds = array<i64: 16, 32>}, {transform_indices = @transform_9, window_bounds = array<i64: 16, 32>}]} {
    %c0 = arith.constant 0 : index
    %c0_0 = arith.constant 0 : index
    %0 = vector.load %arg1[%c0, %c0_0] : memref<16x32xf32, #tpu.memory_space<vmem>>, vector<16x32xf32>
    %1 = arith.truncf %0 : vector<16x32xf32> to vector<16x32xbf16>
    %c0_1 = arith.constant 0 : index
    %c0_2 = arith.constant 0 : index
    %2 = vector.load %arg2[%c0_1, %c0_2] : memref<32x32xbf16, #tpu.memory_space<vmem>>, vector<32x32xbf16>
    %cst = arith.constant dense<0.000000e+00> : vector<16x32xf32>
    %3 = tpu.matmul %1, %2, %cst {dimension_numbers = #tpu.dot_dimension_numbers<[1], [0], [0], [1], [0, 0, 1, 1], [], []>} : vector<16x32xbf16>, vector<32x32xbf16>, vector<16x32xf32> -> vector<16x32xf32>
    %c0_3 = arith.constant 0 : index
    %c0_4 = arith.constant 0 : index
    %4 = vector.load %arg5[%c0_3, %c0_4] : memref<1x32xf32, #tpu.memory_space<vmem>>, vector<1x32xf32>
    %5 = vector.broadcast %4 : vector<1x32xf32> to vector<16x32xf32>
    %6 = arith.addf %3, %5 : vector<16x32xf32>
    %c0_5 = arith.constant 0 : index
    %c0_6 = arith.constant 0 : index
    %7 = vector.load %arg3[%c0_5, %c0_6] : memref<32x32xbf16, #tpu.memory_space<vmem>>, vector<32x32xbf16>
    %cst_7 = arith.constant dense<0.000000e+00> : vector<16x32xf32>
    %8 = tpu.matmul %1, %7, %cst_7 {dimension_numbers = #tpu.dot_dimension_numbers<[1], [0], [0], [1], [0, 0, 1, 1], [], []>} : vector<16x32xbf16>, vector<32x32xbf16>, vector<16x32xf32> -> vector<16x32xf32>
    %c0_8 = arith.constant 0 : index
    %c0_9 = arith.constant 0 : index
    %9 = vector.load %arg6[%c0_8, %c0_9] : memref<1x32xf32, #tpu.memory_space<vmem>>, vector<1x32xf32>
    %10 = vector.broadcast %9 : vector<1x32xf32> to vector<16x32xf32>
    %11 = arith.addf %8, %10 : vector<16x32xf32>
    %c0_10 = arith.constant 0 : index
    %c0_11 = arith.constant 0 : index
    %12 = vector.load %arg4[%c0_10, %c0_11] : memref<32x32xbf16, #tpu.memory_space<vmem>>, vector<32x32xbf16>
    %cst_12 = arith.constant dense<0.000000e+00> : vector<16x32xf32>
    %13 = tpu.matmul %1, %12, %cst_12 {dimension_numbers = #tpu.dot_dimension_numbers<[1], [0], [0], [1], [0, 0, 1, 1], [], []>} : vector<16x32xbf16>, vector<32x32xbf16>, vector<16x32xf32> -> vector<16x32xf32>
    %c0_13 = arith.constant 0 : index
    %c0_14 = arith.constant 0 : index
    %14 = vector.load %arg7[%c0_13, %c0_14] : memref<1x32xf32, #tpu.memory_space<vmem>>, vector<1x32xf32>
    %15 = vector.broadcast %14 : vector<1x32xf32> to vector<16x32xf32>
    %16 = arith.addf %13, %15 : vector<16x32xf32>
    %17 = arith.truncf %6 : vector<16x32xf32> to vector<16x32xbf16>
    %c0_15 = arith.constant 0 : index
    %c0_16 = arith.constant 0 : index
    %18 = vector.load %arg8[%c0_15, %c0_16] : memref<16x32xbf16, #tpu.memory_space<vmem>>, vector<16x32xbf16>
    tpu.vector_store %arg8[%c0_15, %c0_16], %17 {strides = array<i32>} : memref<16x32xbf16, #tpu.memory_space<vmem>>, vector<16x32xbf16>,
    %19 = arith.truncf %11 : vector<16x32xf32> to vector<16x32xbf16>
    %c0_17 = arith.constant 0 : index
    %c0_18 = arith.constant 0 : index
    %20 = vector.load %arg9[%c0_17, %c0_18] : memref<16x32xbf16, #tpu.memory_space<vmem>>, vector<16x32xbf16>
    tpu.vector_store %arg9[%c0_17, %c0_18], %19 {strides = array<i32>} : memref<16x32xbf16, #tpu.memory_space<vmem>>, vector<16x32xbf16>,
    %21 = arith.truncf %16 : vector<16x32xf32> to vector<16x32xbf16>
    %c0_19 = arith.constant 0 : index
    %c0_20 = arith.constant 0 : index
    %22 = vector.load %arg10[%c0_19, %c0_20] : memref<16x32xbf16, #tpu.memory_space<vmem>>, vector<16x32xbf16>
    tpu.vector_store %arg10[%c0_19, %c0_20], %21 {strides = array<i32>} : memref<16x32xbf16, #tpu.memory_space<vmem>>, vector<16x32xbf16>,
    return
  }
  func.func @transform_0(%arg0: i32) -> (i32, i32) {
    %c0_i32 = arith.constant 0 : i32
    %c0_i32_0 = arith.constant 0 : i32
    return %arg0, %c0_i32 : i32, i32
  }
  func.func @transform_1(%arg0: i32) -> (i32, i32) {
    %c0_i32 = arith.constant 0 : i32
    %c0_i32_0 = arith.constant 0 : i32
    %c0_i32_1 = arith.constant 0 : i32
    return %c0_i32, %c0_i32_0 : i32, i32
  }
  func.func @transform_2(%arg0: i32) -> (i32, i32) {
    %c0_i32 = arith.constant 0 : i32
    %c0_i32_0 = arith.constant 0 : i32
    %c0_i32_1 = arith.constant 0 : i32
    return %c0_i32, %c0_i32_0 : i32, i32
  }
  func.func @transform_3(%arg0: i32) -> (i32, i32) {
    %c0_i32 = arith.constant 0 : i32
    %c0_i32_0 = arith.constant 0 : i32
    %c0_i32_1 = arith.constant 0 : i32
    return %c0_i32, %c0_i32_0 : i32, i32
  }
  func.func @transform_4(%arg0: i32) -> (i32, i32) {
    %c0_i32 = arith.constant 0 : i32
    %c0_i32_0 = arith.constant 0 : i32
    %c0_i32_1 = arith.constant 0 : i32
    return %c0_i32, %c0_i32_0 : i32, i32
  }
  func.func @transform_5(%arg0: i32) -> (i32, i32) {
    %c0_i32 = arith.constant 0 : i32
    %c0_i32_0 = arith.constant 0 : i32
    %c0_i32_1 = arith.constant 0 : i32
    return %c0_i32, %c0_i32_0 : i32, i32
  }
  func.func @transform_6(%arg0: i32) -> (i32, i32) {
    %c0_i32 = arith.constant 0 : i32
    %c0_i32_0 = arith.constant 0 : i32
    %c0_i32_1 = arith.constant 0 : i32
    return %c0_i32, %c0_i32_0 : i32, i32
  }
  func.func @transform_7(%arg0: i32) -> (i32, i32) {
    %c0_i32 = arith.constant 0 : i32
    %c0_i32_0 = arith.constant 0 : i32
    return %arg0, %c0_i32 : i32, i32
  }
  func.func @transform_8(%arg0: i32) -> (i32, i32) {
    %c0_i32 = arith.constant 0 : i32
    %c0_i32_0 = arith.constant 0 : i32
    return %arg0, %c0_i32 : i32, i32
  }
  func.func @transform_9(%arg0: i32) -> (i32, i32) {
    %c0_i32 = arith.constant 0 : i32
    %c0_i32_0 = arith.constant 0 : i32
    return %arg0, %c0_i32 : i32, i32
  }
}

</mosaic_0001>

<bundles_post_ra>
// kernel: tpu_custom_call.1
= control target key start
LH: loop header
LB: loop body
LE: loop exit
PB: predicated region body
PF: predicated region fallthrough
CT: control target
= control target key end

     0   :  { %15 = vsyncpa [#allocation3], 0  ;;  %s613_s0 = inlined_call_operand.hbm [shape: f32[16,32], index: 0, kind: input, shape index: {}]   ;;  %s614_s1 = inlined_call_operand.hbm [shape: bf16[32,32], index: 1, kind: input, shape index: {}]   ;;  %s615_s2 = inlined_call_operand.hbm [shape: bf16[32,32], index: 2, kind: input, shape index: {}]   ;;  %s616_s3 = inlined_call_operand.hbm [shape: bf16[32,32], index: 3, kind: input, shape index: {}]   ;;  %s617_s4 = inlined_call_operand.vmem [shape: f32[1,32], index: 4, kind: input, shape index: {}]   ;;  %s618_s5 = inlined_call_operand.vmem [shape: f32[1,32], index: 5, kind: input, shape index: {}]   ;;  %s619_s6 = inlined_call_operand.vmem [shape: f32[1,32], index: 6, kind: input, shape index: {}]   ;;  %s620_s7 = inlined_call_operand.hbm [shape: bf16[16,32], index: 7, kind: output, shape index: {0}]   ;;  %s621_s8 = inlined_call_operand.hbm [shape: bf16[16,32], index: 8, kind: output, shape index: {1}]   ;;  %s622_s9 = inlined_call_operand.hbm [shape: bf16[16,32], index: 9, kind: output, shape index: {2}]  }
   0x1   :  { %16 = vsyncpa [#allocation6], 0 }
   0x2   :  { %17 = vsyncpa [#allocation9], 0 }
   0x3   :  { %18 = vsyncpa [#allocation4], 0  ;;  %s37_s11 = sshll.u32 %s614_s1, 4  ;;  %s38_s11 = int_to_ptr.hbm [resolvable:$true] %s37_s11 }
   0x4   :  { %19 = vsyncpa [#allocation12], 0  ;;  %s498_s12 = smov [#allocation5]   ;;  %s24_s16 = sshll.u32 %s613_s0, 4  ;;  %s25_s16 = int_to_ptr.hbm [resolvable:$true] %s24_s16 }
   0x5   :  { %s39_s13 = sshll.u32 %s498_s12, 4  ;;  %s499_s17 = smov 64   ;;  %s40_s13 = int_to_ptr.vmem [resolvable:$true] %s39_s13 }
   0x6   :  { %s500_s18 = smov 4   ;;  %s501_s19 = smov [#allocation2]  }
   0x7   :  { %45 = dma.hbm_to_vmem [thread:$0]  %s38_s11, 256, %s40_s13, [#allocation6], %s499_s17, %s499_s17, %s500_s18  }
   0x8   :  { %s26_s20 = sshll.u32 %s501_s19, 4  ;;  %s502_s1 = smov 128   ;;  %s27_s20 = int_to_ptr.vmem [resolvable:$true] %s26_s20 }
   0x9   :  { %s503_s21 = smov 8   ;;  %s50_s24 = sshll.u32 %s615_s2, 4  ;;  %s51_s24 = int_to_ptr.hbm [resolvable:$true] %s50_s24 }
   0xa   :  { %32 = dma.hbm_to_vmem [thread:$0]  %s25_s16, 256, %s27_s20, [#allocation3], %s502_s1, %s502_s1, %s503_s21  }
   0xb   :  { %s504_s25 = smov [#allocation7]   ;;  %s63_s28 = sshll.u32 %s616_s3, 4  ;;  %s64_s28 = int_to_ptr.hbm [resolvable:$true] %s63_s28 }
   0xc   :  { %s52_s0 = sshll.u32 %s504_s25, 4  ;;  %s505_s29 = smov [#allocation8]   ;;  %s53_s0 = int_to_ptr.vmem [resolvable:$true] %s52_s0 }
   0xd   :  { %58 = dma.hbm_to_vmem [thread:$0]  %s51_s24, 256, %s53_s0, [#allocation6], %s499_s17, %s499_s17, %s500_s18  }
   0xe   :  { %s65_s30 = sshll.u32 %s505_s29, 4  ;;  %s66_s30 = int_to_ptr.vmem [resolvable:$true] %s65_s30 }
   0xf   :  { %71 = dma.hbm_to_vmem [thread:$0]  %s64_s28, 256, %s66_s30, [#allocation9], %s499_s17, %s499_s17, %s500_s18  }
  0x10   :  { %488 = dma.done.wait [#allocation3], 256  }
  0x11   :  { %489 = vsyncadd [#allocation3], 4294967040 }
  0x12   :  { %490 = dma.done.wait [#allocation6], 512  }
  0x13   :  { %491 = vsyncadd [#allocation6], 4294966784 }
  0x14   :  { %492 = dma.done.wait [#allocation9], 256  }
  0x15   :  { %493 = vsyncadd [#allocation9], 4294967040  ;;  %v301_v0 = vld [vmem:[#allocation5 + $0x8] sm:$0xff]  ;;  %v303_v1 = vld [vmem:[#allocation7 + $0x8] sm:$0xff]  ;;  %vm118_vm0 = vcmask 261120   ;;  %vm206_vm1 = vcmask 257024  }
  0x16   :  { %v305_v2 = vld [vmem:[#allocation8 + $0x8] sm:$0xff]  ;;  %v300_v3 = vld [vmem:[#allocation5] sm:$0xff]  ;;  %v302_v4 = vld [vmem:[#allocation7] sm:$0xff]  ;;  %128 = vmatpush.bf16.msra.mxu0 %v301_v0  ;;  %162 = vmatpush.bf16.msra.mxu1 %v303_v1  ;;  %s223_s16 = sshll.u32 %s620_s7, 4  ;;  %s507_s19 = smov [#allocation11]   ;;  %s224_s16 = int_to_ptr.hbm [resolvable:$true] %s223_s16 }
  0x17   :  { %v95_v5 = vld [vmem:[#allocation2] sm:$0xff]  ;;  %v96_v6 = vld [vmem:[#allocation2 + $0x8] sm:$0xff]  ;;  %196 = vmatpush.bf16.msra.mxu2 %v305_v2  ;;  %v304_v7 = vld [vmem:[#allocation8] sm:$0xff]  ;;  %s234_s20 = sshll.u32 %s507_s19, 4  ;;  %s236_s21 = sshll.u32 %s621_s8, 4  ;;  %s235_s20 = int_to_ptr.vmem [resolvable:$true] %s234_s20  ;;  %s237_s21 = int_to_ptr.hbm [resolvable:$true] %s236_s21 }
  0x18   :  { %v97_v8 = vpack.c.bf16 %v96_v6, %v95_v5  ;;  %v317_v9 = vld [vmem:[%s617_s4] ss:$0 sm:$0xff]  ;;  %s506_s4 = smov [#allocation10]   ;;  %s508_s7 = smov [#allocation13]  }
  0x19   :  { %v318_v10 = vld [vmem:[%s618_s5] ss:$0 sm:$0xff]  ;;  %s221_s5 = sshll.u32 %s506_s4, 4  ;;  %s247_s22 = sshll.u32 %s508_s7, 4  ;;  %s222_s5 = int_to_ptr.vmem [resolvable:$true] %s221_s5  ;;  %s248_s22 = int_to_ptr.vmem [resolvable:$true] %s247_s22 }
  0x1a   :  { %129 = vmatpush.bf16.msra.mxu0 %v300_v3  ;;  %163 = vmatpush.bf16.msra.mxu1 %v302_v4  ;;  %v319_v17 = vld [vmem:[%s619_s6] ss:$0 sm:$0xff]  ;;  %s249_s25 = sshll.u32 %s622_s9, 4  ;;  %s250_s25 = int_to_ptr.hbm [resolvable:$true] %s249_s25 }
  0x1b   :  { %197 = vmatpush.bf16.msra.mxu2 %v304_v7 }
  0x1d   :  { %281 = vmatmul.msk.bf16.vlgmr.msra.gmra.mxu0 %vm118_vm0, %v97_v8  ;;  %290 = vmatmul.msk.bf16.vlgmr.msra.gmra.mxu1 %vm118_vm0, %v97_v8 }
  0x1e   :  { %299 = vmatmul.msk.bf16.vlgmr.msra.gmra.mxu2 %vm118_vm0, %v97_v8 }
  0x9a   :  { %v131_v11 = vpop.f32.mrf.mxu0  ;;  %v165_v12 = vpop.f32.mrf.mxu1 }
  0x9b   :  { %v132_v13 = vadd.f32 %v317_v9, %v131_v11  ;;  %v166_v14 = vadd.f32 %v318_v10, %v165_v12 }
  0x9d   :  { %v204_v15 = vpack.c.bf16 %v132_v13, %v132_v13  ;;  %v209_v16 = vpack.c.bf16 %v166_v14, %v166_v14 }
  0x9f   :  { %207 = vst.msk [vmem:[#allocation10] sm:$0xf] %vm206_vm1, %v204_v15 }
  0xa0   :  { %211 = vst.msk [vmem:[#allocation11] sm:$0xf] %vm206_vm1, %v209_v16 }
  0xa1   :  { %v199_v18 = vpop.f32.mrf.mxu2 }
  0xa2   :  { %v200_v19 = vadd.f32 %v319_v17, %v199_v18  ;;  %v133_v20 = vpop.f32.mrf.mxu0  ;;  %v167_v21 = vpop.f32.mrf.mxu1 }
  0xa3   :  { %v134_v22 = vadd.f32 %v317_v9, %v133_v20  ;;  %v168_v23 = vadd.f32 %v318_v10, %v167_v21 }
  0xa4   :  { %v213_v24 = vpack.c.bf16 %v200_v19, %v200_v19 }
  0xa5   :  { %v205_v25 = vpack.c.bf16 %v134_v22, %v134_v22  ;;  %v210_v26 = vpack.c.bf16 %v168_v23, %v168_v23 }
  0xa6   :  { %215 = vst.msk [vmem:[#allocation13] sm:$0xf] %vm206_vm1, %v213_v24 }
  0xa7   :  { %208 = vst.msk [vmem:[#allocation10 + $0x4] sm:$0xf] %vm206_vm1, %v205_v25 }
  0xa8   :  { %212 = vst.msk [vmem:[#allocation11 + $0x4] sm:$0xf] %vm206_vm1, %v210_v26  ;;  %229 = dma.vmem_to_hbm [thread:$0]  %s222_s5, 128, %s224_s16, [#allocation4], %s499_s17, %s499_s17, %s500_s18  }
  0xa9   :  { %v201_v27 = vpop.f32.mrf.mxu2  ;;  %242 = dma.vmem_to_hbm [thread:$0]  %s235_s20, 128, %s237_s21, [#allocation12], %s499_s17, %s499_s17, %s500_s18  }
  0xaa   :  { %v202_v28 = vadd.f32 %v319_v17, %v201_v27 }
  0xac   :  { %v214_v29 = vpack.c.bf16 %v202_v28, %v202_v28 }
  0xae   :  { %216 = vst.msk [vmem:[#allocation13 + $0x4] sm:$0xf] %vm206_vm1, %v214_v29 }
  0xaf   :  { %255 = dma.vmem_to_hbm [thread:$0]  %s248_s22, 128, %s250_s25, [#allocation12], %s499_s17, %s499_s17, %s500_s18  }
  0xb0   :  { %494 = dma.done.wait [#allocation4], 128  }
  0xb1   :  { %495 = vsyncadd [#allocation4], 4294967168 }
  0xb2   :  { %496 = dma.done.wait [#allocation12], 256  }
  0xb3   :  { %497 = vsyncadd [#allocation12], 4294967040 }
  0xb4   :  { %268 = vsyncpa [#allocation3], 1 }
  0xb5   :  { %269 = vsyncpa [#allocation6], 1 }
  0xb6   :  { %270 = vsyncpa [#allocation9], 1 }
  0xb7   :  { %271 = vsyncpa [#allocation4], 1 }
  0xb8   :  { %272 = vsyncpa [#allocation12], 1 }

</bundles_post_ra>
